<compile_context>
chip_gen: v7x
topology: tpu7x:2x2x1
jax: 0.10.0
libtpu: 0.0.40
codegen_flags: <defaults>
</compile_context>

<pallas_src>
import functools

import jax
import jax.numpy as jnp
from jax.experimental import pallas as pl
from jax.experimental.pallas import tpu as pltpu

BN_EPS = 1e-5
LANES = 128
H1, H2 = 32, 16          # per-branch hidden widths (fused widths: 64, 32)


def _round_up(n, m):
    return (n + m - 1) // m * m


# -----------------------------------------------------------------------------
# Kernel
# -----------------------------------------------------------------------------
def _critic_kernel(x_ref, u_ref, slab_ref, out_ref, *, S, A, pad_s, pad_a):
    # Row offsets inside the packed parameter slab (all 8-aligned).
    r_u = pad_s                     # action-rows of the fused layer-1 weight
    r_w2 = pad_s + pad_a            # fused block-diag layer-2 weight (128 rows)
    r_w3 = r_w2 + LANES             # fused block-diag layer-3 weight (128 rows)
    r_bn = r_w3 + LANES             # BN gammas/betas + head bias     (8 rows)

    x = x_ref[...]                                    # (B, S)
    u = u_ref[...]                                    # (B, A)

    w1x = slab_ref[0:pad_s, :][:S, :]                 # (S, 128)
    w1u = slab_ref[r_u:r_w2, :][:A, :]                # (A, 128)
    w2 = slab_ref[r_w2:r_w3, :]                       # (128, 128)
    w3 = slab_ref[r_w3:r_bn, :]                       # (128, 128)
    bn = slab_ref[r_bn:r_bn + 8, :]                   # (8, 128)
    g1, be1 = bn[0:1, :], bn[1:2, :]
    g2, be2 = bn[2:3, :], bn[3:4, :]
    b_head = bn[4:5, :]

    def bn_relu(h, g, be):
        # Training-mode BatchNorm1d: batch mean, biased variance, eps=1e-5.
        m = jnp.mean(h, axis=0, keepdims=True)
        m2 = jnp.mean(h * h, axis=0, keepdims=True)
        var = jnp.maximum(m2 - m * m, 0.0)
        hn = (h - m) * jax.lax.rsqrt(var + BN_EPS)
        return jnp.maximum(hn * g + be, 0.0)

    # Layer 1 (implicit concat of x and u via split weight rows).
    h = (jnp.dot(x, w1x, preferred_element_type=jnp.float32)
         + jnp.dot(u, w1u, preferred_element_type=jnp.float32))   # (B, 128)
    h = bn_relu(h, g1, be1)
    # Layer 2 (block-diagonal, both branches at once).
    h = jnp.dot(h, w2, preferred_element_type=jnp.float32)        # (B, 128)
    h = bn_relu(h, g2, be2)
    # Layer 3 head (only lanes 0/1 are meaningful).
    h = jnp.dot(h, w3, preferred_element_type=jnp.float32) + b_head
    out_ref[...] = h[:, 0:2]                                      # (B, 2)


# -----------------------------------------------------------------------------
# Parameter packing (done once, outside the hot path)
# -----------------------------------------------------------------------------
def pack_critic_params(params, state_dim, action_dim):
    """Pack all fused weights / BN params into one (rows, 128) f32 slab."""
    S, A = state_dim, action_dim
    pad_s = _round_up(S, 8)
    pad_a = _round_up(A, 8)
    rows = pad_s + pad_a + LANES + LANES + 8
    slab = jnp.zeros((rows, LANES), jnp.float32)

    # Layer 1: [w1 | w4] split into state rows and action rows.
    w1f = jnp.concatenate([params["w1"], params["w4"]], axis=1)   # (S+A, 64)
    slab = slab.at[0:S, 0:2 * H1].set(w1f[:S])
    slab = slab.at[pad_s:pad_s + A, 0:2 * H1].set(w1f[S:])

    # Layer 2: block-diag(w2, w5)  ->  (64, 32) block inside a (128,128) tile.
    r_w2 = pad_s + pad_a
    slab = slab.at[r_w2:r_w2 + H1, 0:H2].set(params["w2"])
    slab = slab.at[r_w2 + H1:r_w2 + 2 * H1, H2:2 * H2].set(params["w5"])

    # Layer 3: block-diag(w3, w6)  ->  lanes 0 / 1.
    r_w3 = r_w2 + LANES
    slab = slab.at[r_w3:r_w3 + H2, 0:1].set(params["w3"])
    slab = slab.at[r_w3 + H2:r_w3 + 2 * H2, 1:2].set(params["w6"])

    # BN params + head bias (8 rows).  Padded lanes stay 0; they only ever
    # multiply exact zeros, so the value is irrelevant.
    r_bn = r_w3 + LANES
    slab = slab.at[r_bn + 0, 0:H1].set(params["g1"][0])
    slab = slab.at[r_bn + 0, H1:2 * H1].set(params["g3"][0])
    slab = slab.at[r_bn + 1, 0:H1].set(params["be1"][0])
    slab = slab.at[r_bn + 1, H1:2 * H1].set(params["be3"][0])
    slab = slab.at[r_bn + 2, 0:H2].set(params["g2"][0])
    slab = slab.at[r_bn + 2, H2:2 * H2].set(params["g4"][0])
    slab = slab.at[r_bn + 3, 0:H2].set(params["be2"][0])
    slab = slab.at[r_bn + 3, H2:2 * H2].set(params["be4"][0])
    slab = slab.at[r_bn + 4, 0:1].set(params["b3"][0])
    slab = slab.at[r_bn + 4, 1:2].set(params["b6"][0])
    # NOTE: b1/b2/b4/b5 are intentionally NOT packed — they are exactly
    # cancelled by the training-mode BatchNorm mean subtraction.
    return slab


# -----------------------------------------------------------------------------
# Forward wrapper
# -----------------------------------------------------------------------------
def critic_forward(x, u, slab, state_dim, action_dim):
    """x: (B, state_dim), u: (B, action_dim). Returns (q1, q2), each (B, 1)."""
    B = x.shape[0]
    pad_s = _round_up(state_dim, 8)
    pad_a = _round_up(action_dim, 8)

    kernel = functools.partial(_critic_kernel, S=state_dim, A=action_dim,
                               pad_s=pad_s, pad_a=pad_a)
    vmem = pl.BlockSpec(memory_space=pltpu.MemorySpace.VMEM)

    out = pl.pallas_call(
        kernel,
        out_shape=jax.ShapeDtypeStruct((B, 2), jnp.float32),
        in_specs=[vmem, vmem, vmem],
        out_specs=vmem,
    )(x.astype(jnp.float32), u.astype(jnp.float32), slab)
    return out[:, 0:1], out[:, 1:2]


# -----------------------------------------------------------------------------
# Parameter init (mimics PyTorch Linear fan-in uniform) + pure-JAX reference
# -----------------------------------------------------------------------------
def init_critic_params(state_dim, action_dim, seed=0):
    key = jax.random.PRNGKey(seed)
    d = state_dim + action_dim

    def linear(key, fan_in, fan_out):
        kw, kb = jax.random.split(key)
        bound = 1.0 / jnp.sqrt(jnp.float32(fan_in))
        w = jax.random.uniform(kw, (fan_in, fan_out), jnp.float32, -bound, bound)
        b = jax.random.uniform(kb, (1, fan_out), jnp.float32, -bound, bound)
        return w, b

    keys = jax.random.split(key, 6)
    w1, b1 = linear(keys[0], d, H1)
    w2, b2 = linear(keys[1], H1, H2)
    w3, b3 = linear(keys[2], H2, 1)
    w4, b4 = linear(keys[3], d, H1)
    w5, b5 = linear(keys[4], H1, H2)
    w6, b6 = linear(keys[5], H2, 1)

    def bn_params(n):
        return jnp.ones((1, n), jnp.float32), jnp.zeros((1, n), jnp.float32)

    g1, be1 = bn_params(H1)
    g2, be2 = bn_params(H2)
    g3, be3 = bn_params(H1)
    g4, be4 = bn_params(H2)

    return dict(w1=w1, b1=b1, g1=g1, be1=be1, w2=w2, b2=b2, g2=g2, be2=be2,
                w3=w3, b3=b3, w4=w4, b4=b4, g3=g3, be3=be3, w5=w5, b5=b5,
                g4=g4, be4=be4, w6=w6, b6=b6)


def critic_reference(x, u, params):
    """Pure-JAX reference mirroring the PyTorch module (incl. all biases)."""
    xu = jnp.concatenate([x, u], axis=1).astype(jnp.float32)

    def bn(h, g, be):
        m = jnp.mean(h, axis=0, keepdims=True)
        v = jnp.mean((h - m) ** 2, axis=0, keepdims=True)
        return (h - m) / jnp.sqrt(v + BN_EPS) * g + be

    def branch(wa, ba, ga, bea, wb, bb, gb, beb, wc, bc):
        h = jnp.maximum(bn(xu @ wa + ba, ga, bea), 0.0)
        h = jnp.maximum(bn(h @ wb + bb, gb, beb), 0.0)
        return h @ wc + bc

    p = params
    q1 = branch(p["w1"], p["b1"], p["g1"], p["be1"], p["w2"], p["b2"],
                p["g2"], p["be2"], p["w3"], p["b3"])
    q2 = branch(p["w4"], p["b4"], p["g3"], p["be3"], p["w5"], p["b5"],
                p["g4"], p["be4"], p["w6"], p["b6"])
    return q1, q2


if __name__ == "__main__":
    STATE_DIM, ACTION_DIM, BATCH = 12, 4, 8

    key = jax.random.PRNGKey(0)
    kx, ku = jax.random.split(key)
    x = jax.random.normal(kx, (BATCH, STATE_DIM), jnp.float32)
    u = jax.random.normal(ku, (BATCH, ACTION_DIM), jnp.float32)

    params = init_critic_params(STATE_DIM, ACTION_DIM, seed=0)
    slab = pack_critic_params(params, STATE_DIM, ACTION_DIM)

    q1, q2 = jax.block_until_ready(
        critic_forward(x, u, slab, STATE_DIM, ACTION_DIM))
    r1, r2 = critic_reference(x, u, params)

    assert q1.shape == (BATCH, 1) and q2.shape == (BATCH, 1)
    assert jnp.allclose(q1, r1, atol=1e-4, rtol=1e-4)
    assert jnp.allclose(q2, r2, atol=1e-4, rtol=1e-4)

    print("KERNEL_OK")
</pallas_src>

<mosaic_0001>
module attributes {stable_mosaic.version = 11 : i64} {
  func.func @_critic_kernel(%arg0: memref<8x12xf32, #tpu.memory_space<vmem>>, %arg1: memref<8x4xf32, #tpu.memory_space<vmem>>, %arg2: memref<288x128xf32, #tpu.memory_space<vmem>>, %arg3: memref<8x2xf32, #tpu.memory_space<vmem>>) attributes {dimension_semantics = [], scalar_prefetch = 0 : i64, scratch_operands = 0 : i64, tpu.core_type = #tpu.core_type<tc>} {
    %c0 = arith.constant 0 : index
    %c0_0 = arith.constant 0 : index
    %0 = vector.load %arg0[%c0, %c0_0] : memref<8x12xf32, #tpu.memory_space<vmem>>, vector<8x12xf32>
    %c0_1 = arith.constant 0 : index
    %c0_2 = arith.constant 0 : index
    %1 = vector.load %arg1[%c0_1, %c0_2] : memref<8x4xf32, #tpu.memory_space<vmem>>, vector<8x4xf32>
    %c0_3 = arith.constant 0 : index
    %c0_4 = arith.constant 0 : index
    %2 = vector.load %arg2[%c0_3, %c0_4] : memref<288x128xf32, #tpu.memory_space<vmem>>, vector<16x128xf32>
    %3 = vector.extract_strided_slice %2 {offsets = [0, 0], sizes = [12, 128], strides = [1, 1]} : vector<16x128xf32> to vector<12x128xf32>
    %c16 = arith.constant 16 : index
    %c0_5 = arith.constant 0 : index
    %4 = vector.load %arg2[%c16, %c0_5] : memref<288x128xf32, #tpu.memory_space<vmem>>, vector<8x128xf32>
    %5 = vector.extract_strided_slice %4 {offsets = [0, 0], sizes = [4, 128], strides = [1, 1]} : vector<8x128xf32> to vector<4x128xf32>
    %c24 = arith.constant 24 : index
    %c0_6 = arith.constant 0 : index
    %6 = vector.load %arg2[%c24, %c0_6] : memref<288x128xf32, #tpu.memory_space<vmem>>, vector<128x128xf32>
    %c152 = arith.constant 152 : index
    %c0_7 = arith.constant 0 : index
    %7 = vector.load %arg2[%c152, %c0_7] : memref<288x128xf32, #tpu.memory_space<vmem>>, vector<128x128xf32>
    %c280 = arith.constant 280 : index
    %c0_8 = arith.constant 0 : index
    %8 = vector.load %arg2[%c280, %c0_8] : memref<288x128xf32, #tpu.memory_space<vmem>>, vector<8x128xf32>
    %9 = vector.extract_strided_slice %8 {offsets = [0, 0], sizes = [1, 128], strides = [1, 1]} : vector<8x128xf32> to vector<1x128xf32>
    %10 = vector.extract_strided_slice %8 {offsets = [1, 0], sizes = [1, 128], strides = [1, 1]} : vector<8x128xf32> to vector<1x128xf32>
    %11 = vector.extract_strided_slice %8 {offsets = [2, 0], sizes = [1, 128], strides = [1, 1]} : vector<8x128xf32> to vector<1x128xf32>
    %12 = vector.extract_strided_slice %8 {offsets = [3, 0], sizes = [1, 128], strides = [1, 1]} : vector<8x128xf32> to vector<1x128xf32>
    %13 = vector.extract_strided_slice %8 {offsets = [4, 0], sizes = [1, 128], strides = [1, 1]} : vector<8x128xf32> to vector<1x128xf32>
    %cst = arith.constant dense<0.000000e+00> : vector<8x128xf32>
    %14 = tpu.matmul %0, %3, %cst {dimension_numbers = #tpu.dot_dimension_numbers<[1], [0], [0], [1], [0, 0, 1, 1], [], []>} : vector<8x12xf32>, vector<12x128xf32>, vector<8x128xf32> -> vector<8x128xf32>
    %cst_9 = arith.constant dense<0.000000e+00> : vector<8x128xf32>
    %15 = tpu.matmul %1, %5, %cst_9 {dimension_numbers = #tpu.dot_dimension_numbers<[1], [0], [0], [1], [0, 0, 1, 1], [], []>} : vector<8x4xf32>, vector<4x128xf32>, vector<8x128xf32> -> vector<8x128xf32>
    %16 = arith.addf %14, %15 : vector<8x128xf32>
    %cst_10 = arith.constant dense<0.000000e+00> : vector<128xf32>
    %17 = vector.multi_reduction <add>, %16, %cst_10 [0] : vector<8x128xf32> to vector<128xf32>
    %18 = vector.shape_cast %17 : vector<128xf32> to vector<1x128xf32>
    %cst_11 = arith.constant 8.000000e+00 : f32
    %19 = vector.broadcast %cst_11 : f32 to vector<1x128xf32>
    %20 = arith.divf %18, %19 : vector<1x128xf32>
    %21 = arith.mulf %16, %16 : vector<8x128xf32>
    %cst_12 = arith.constant dense<0.000000e+00> : vector<128xf32>
    %22 = vector.multi_reduction <add>, %21, %cst_12 [0] : vector<8x128xf32> to vector<128xf32>
    %23 = vector.shape_cast %22 : vector<128xf32> to vector<1x128xf32>
    %cst_13 = arith.constant 8.000000e+00 : f32
    %24 = vector.broadcast %cst_13 : f32 to vector<1x128xf32>
    %25 = arith.divf %23, %24 : vector<1x128xf32>
    %26 = arith.mulf %20, %20 : vector<1x128xf32>
    %27 = arith.subf %25, %26 : vector<1x128xf32>
    %cst_14 = arith.constant 0.000000e+00 : f32
    %28 = vector.broadcast %cst_14 : f32 to vector<1x128xf32>
    %29 = arith.maximumf %27, %28 : vector<1x128xf32>
    %30 = vector.broadcast %20 : vector<1x128xf32> to vector<8x128xf32>
    %31 = arith.subf %16, %30 : vector<8x128xf32>
    %cst_15 = arith.constant 9.99999974E-6 : f32
    %32 = vector.broadcast %cst_15 : f32 to vector<1x128xf32>
    %33 = arith.addf %29, %32 : vector<1x128xf32>
    %34 = math.rsqrt %33 : vector<1x128xf32>
    %35 = vector.broadcast %34 : vector<1x128xf32> to vector<8x128xf32>
    %36 = arith.mulf %31, %35 : vector<8x128xf32>
    %37 = vector.broadcast %9 : vector<1x128xf32> to vector<8x128xf32>
    %38 = arith.mulf %36, %37 : vector<8x128xf32>
    %39 = vector.broadcast %10 : vector<1x128xf32> to vector<8x128xf32>
    %40 = arith.addf %38, %39 : vector<8x128xf32>
    %cst_16 = arith.constant 0.000000e+00 : f32
    %41 = vector.broadcast %cst_16 : f32 to vector<8x128xf32>
    %42 = arith.maximumf %40, %41 : vector<8x128xf32>
    %cst_17 = arith.constant dense<0.000000e+00> : vector<8x128xf32>
    %43 = tpu.matmul %42, %6, %cst_17 {dimension_numbers = #tpu.dot_dimension_numbers<[1], [0], [0], [1], [0, 0, 1, 1], [], []>} : vector<8x128xf32>, vector<128x128xf32>, vector<8x128xf32> -> vector<8x128xf32>
    %cst_18 = arith.constant dense<0.000000e+00> : vector<128xf32>
    %44 = vector.multi_reduction <add>, %43, %cst_18 [0] : vector<8x128xf32> to vector<128xf32>
    %45 = vector.shape_cast %44 : vector<128xf32> to vector<1x128xf32>
    %cst_19 = arith.constant 8.000000e+00 : f32
    %46 = vector.broadcast %cst_19 : f32 to vector<1x128xf32>
    %47 = arith.divf %45, %46 : vector<1x128xf32>
    %48 = arith.mulf %43, %43 : vector<8x128xf32>
    %cst_20 = arith.constant dense<0.000000e+00> : vector<128xf32>
    %49 = vector.multi_reduction <add>, %48, %cst_20 [0] : vector<8x128xf32> to vector<128xf32>
    %50 = vector.shape_cast %49 : vector<128xf32> to vector<1x128xf32>
    %cst_21 = arith.constant 8.000000e+00 : f32
    %51 = vector.broadcast %cst_21 : f32 to vector<1x128xf32>
    %52 = arith.divf %50, %51 : vector<1x128xf32>
    %53 = arith.mulf %47, %47 : vector<1x128xf32>
    %54 = arith.subf %52, %53 : vector<1x128xf32>
    %cst_22 = arith.constant 0.000000e+00 : f32
    %55 = vector.broadcast %cst_22 : f32 to vector<1x128xf32>
    %56 = arith.maximumf %54, %55 : vector<1x128xf32>
    %57 = vector.broadcast %47 : vector<1x128xf32> to vector<8x128xf32>
    %58 = arith.subf %43, %57 : vector<8x128xf32>
    %cst_23 = arith.constant 9.99999974E-6 : f32
    %59 = vector.broadcast %cst_23 : f32 to vector<1x128xf32>
    %60 = arith.addf %56, %59 : vector<1x128xf32>
    %61 = math.rsqrt %60 : vector<1x128xf32>
    %62 = vector.broadcast %61 : vector<1x128xf32> to vector<8x128xf32>
    %63 = arith.mulf %58, %62 : vector<8x128xf32>
    %64 = vector.broadcast %11 : vector<1x128xf32> to vector<8x128xf32>
    %65 = arith.mulf %63, %64 : vector<8x128xf32>
    %66 = vector.broadcast %12 : vector<1x128xf32> to vector<8x128xf32>
    %67 = arith.addf %65, %66 : vector<8x128xf32>
    %cst_24 = arith.constant 0.000000e+00 : f32
    %68 = vector.broadcast %cst_24 : f32 to vector<8x128xf32>
    %69 = arith.maximumf %67, %68 : vector<8x128xf32>
    %cst_25 = arith.constant dense<0.000000e+00> : vector<8x128xf32>
    %70 = tpu.matmul %69, %7, %cst_25 {dimension_numbers = #tpu.dot_dimension_numbers<[1], [0], [0], [1], [0, 0, 1, 1], [], []>} : vector<8x128xf32>, vector<128x128xf32>, vector<8x128xf32> -> vector<8x128xf32>
    %71 = vector.broadcast %13 : vector<1x128xf32> to vector<8x128xf32>
    %72 = arith.addf %70, %71 : vector<8x128xf32>
    %73 = vector.extract_strided_slice %72 {offsets = [0, 0], sizes = [8, 2], strides = [1, 1]} : vector<8x128xf32> to vector<8x2xf32>
    %c0_26 = arith.constant 0 : index
    %c0_27 = arith.constant 0 : index
    %74 = vector.load %arg3[%c0_26, %c0_27] : memref<8x2xf32, #tpu.memory_space<vmem>>, vector<8x2xf32>
    tpu.vector_store %arg3[%c0_26, %c0_27], %73 {strides = array<i32>} : memref<8x2xf32, #tpu.memory_space<vmem>>, vector<8x2xf32>,
    return
  }
}

</mosaic_0001>

<bundles_post_ra>
// kernel: tpu_custom_call.1
= control target key start
LH: loop header
LB: loop body
LE: loop exit
PB: predicated region body
PF: predicated region fallthrough
CT: control target
= control target key end

     0   :  { %8 = vsyncpa [#allocation3], 0  ;;  %s652_s12 = smov [#allocation2]   ;;  %s735_s0 = inlined_call_operand.vmem [shape: f32[8,12], index: 0, kind: input, shape index: {}]   ;;  %s736_s1 = inlined_call_operand.vmem [shape: f32[8,4], index: 1, kind: input, shape index: {}]   ;;  %s737_s2 = inlined_call_operand.hbm [shape: f32[288,128], index: 2, kind: input, shape index: {}]   ;;  %s738_s3 = inlined_call_operand.vmem [shape: f32[8,2], index: 3, kind: output, shape index: {}]  }
   0x1   :  { %s18_s13 = sshll.u32 %s652_s12, 4  ;;  %s628_s16 = scalar_lea.hbm %s737_s2, 4608  ;;  %s19_s13 = int_to_ptr.vmem [resolvable:$true] %s18_s13 }
   0x2   :  { %p629_p0 = scmp.ne.s32.totalorder %s737_s2, %s628_s16  ;;  %p632_p1 = scmp.lt.u32.totalorder %s628_s16, %s737_s2 }
   0x4   :  { %p634_p2 = pnand %p632_p1, %p629_p0 }
   0x6   :  { %637 = shalt.err (!%p634_p2)
}
   0x7   :  { %s638_s21 = scalar_lea.vmem %s19_s13, 4608  ;;  %p643_p4 = scmp.lt.s32.totalorder %s19_s13, %s19_s13 }
   0x8   :  { %p639_p3 = scmp.ne.s32.totalorder %s19_s13, %s638_s21  ;;  %p644_p5 = scmp.lt.s32.totalorder %s638_s21, %s638_s21 }
   0xa   :  { %p645_p6 = por %p644_p5, %p643_p4 }
   0xc   :  { %p646_p7 = pnand %p645_p6, %p639_p3 }
   0xe   :  { %649 = shalt.err (!%p646_p7)
}
   0xf   :  { %s653_s22 = smov 128   ;;  %s654_s23 = smov 8  }
  0x10   :  { %24 = dma.hbm_to_vmem [thread:$0]  %s737_s2, 4608, %s19_s13, [#allocation3], %s653_s22, %s653_s22, %s654_s23  }
  0x11   :  { %650 = dma.done.wait [#allocation3], 4608  }
  0x12   :  { %651 = vsyncadd [#allocation3], 4294962688  ;;  %v655_v0 = vmov 0.0|0.0   ;;  %v656_v1 = vmov 0.0   ;;  %vm657_vm0 = vmmov 0   ;;  %vm70_vm1 = vcmask 1043456  }
  0x13   :  { %564 = vmatprep.subr.bf16.mxu0 %v655_v0  ;;  %482 = vmatprep.subr.mxu1 %v656_v1  ;;  %vm658_vm2 = vmmov 1   ;;  %vm66_vm4 = vcmask 31744   ;;  %v30_v2 = vld [vmem:[#allocation2] sm:$0xff]  ;;  %v31_v3 = vld [vmem:[#allocation2 + $0x8] sm:$0xff]  ;;  %v32_v4 = vld [vmem:[#allocation2 + $0x10] sm:$0xff]  ;;  %vm144_vm5 = vcmask 97280   ;;  %v244_v55 = vlaneseq }
  0x14   :  { %484 = vmatprep.mubr.msk.f32.mxu1 %vm657_vm0, %v656_v1  ;;  %491 = vmatprep.mubr.msk.f32.mxu0 %vm657_vm0, %v656_v1  ;;  %vm566_vm3 = vmpackc.low %vm70_vm1, %vm658_vm2  ;;  %v565_v5 = vpack.c.bf16 %v31_v3, %v30_v2  ;;  %v29_v6 = vld [vmem:[%s736_s1] sm:$0xff]  ;;  %v33_v8 = vld [vmem:[#allocation2 + $0x18] sm:$0xff]  ;;  %vm432_vm6 = vcmask 15360  }
  0x15   :  { %483 = vmatpush3.msk.msra.mxu1 %vm70_vm1, %v32_v4  ;;  %v28_v7 = vld [vmem:[%s735_s0] sm:$0xff]  ;;  %v35_v11 = vld [vmem:[#allocation2 + $0x28] sm:$0xff]  ;;  %v36_v12 = vld [vmem:[#allocation2 + $0x30] sm:$0xff]  ;;  %v711_v57 = vshrl.u32 %v244_v55, 7 }
  0x16   :  { %485 = vmatmul.mubr.msk.f32.vlgmr.msra.gmra.mrb[0].mxu1 %vm66_vm4, %v29_v6  ;;  %568 = vmatprep.subr.bf16.mxu1 %v655_v0  ;;  %v34_v9 = vld [vmem:[#allocation2 + $0x20] sm:$0xff]  ;;  %v572_v13 = vpack.c.bf16 %v36_v12, %v35_v11  ;;  %v37_v14 = vld [vmem:[#allocation2 + $0x38] sm:$0xff]  ;;  %v39_v17 = vld [vmem:[#allocation2 + $0x48] sm:$0xff] }
  0x17   :  { %567 = vmatpush3.bf16.msk.msra.mxu0 %vm566_vm3, %v565_v5  ;;  %526 = vmatprep.mubr.msk.f32.mxu1 %vm657_vm0, %v656_v1  ;;  %v569_v10 = vpack.c.bf16 %v34_v9, %v33_v8  ;;  %v38_v15 = vld [vmem:[#allocation2 + $0x40] sm:$0xff]  ;;  %v40_v18 = vld [vmem:[#allocation2 + $0x50] sm:$0xff]  ;;  %v41_v20 = vld [vmem:[#allocation2 + $0x58] sm:$0xff]  ;;  %v246_v58 = vsub.s32 0, %v711_v57  ;;  %v251_v60 = vsub.s32 1, %v711_v57 }
  0x18   :  { %592 = vmatprep.subr.bf16.mxu0 %v655_v0  ;;  %v575_v16 = vpack.c.bf16 %v38_v15, %v37_v14  ;;  %v578_v19 = vpack.c.bf16 %v40_v18, %v39_v17  ;;  %v42_v21 = vld [vmem:[#allocation2 + $0x60] sm:$0xff]  ;;  %v43_v23 = vld [vmem:[#allocation2 + $0x68] sm:$0xff]  ;;  %v44_v24 = vld [vmem:[#allocation2 + $0x70] sm:$0xff] }
  0x19   :  { %570 = vmatpush3.bf16.msra.mxu1 %v569_v10  ;;  %v581_v22 = vpack.c.bf16 %v42_v21, %v41_v20  ;;  %v584_v25 = vpack.c.bf16 %v44_v24, %v43_v23  ;;  %v45_v26 = vld [vmem:[#allocation2 + $0x78] sm:$0xff]  ;;  %v46_v27 = vld [vmem:[#allocation2 + $0x80] sm:$0xff]  ;;  %v47_v29 = vld [vmem:[#allocation2 + $0x88] sm:$0xff] }
  0x1a   :  { %492 = vmatmul.mubr.msk.f32.vlgmr.msra.gmra.mrb[0].mxu0 %vm144_vm5, %v28_v7  ;;  %571 = vmatprep.subr.bf16.mxu1 %v655_v0  ;;  %v587_v28 = vpack.c.bf16 %v46_v27, %v45_v26  ;;  %v48_v30 = vld [vmem:[#allocation2 + $0x90] sm:$0xff]  ;;  %v714_v59 = vld [vmem:[#allocation2 + $0x118] sm:$0xff]  ;;  %v50_v7 = vld [vmem:[#allocation2 + $0xa0] sm:$0xff] }
  0x1b   :  { %561 = vmatprep.mubr.msk.f32.mxu0 %vm657_vm0, %v656_v1  ;;  %v590_v31 = vpack.c.bf16 %v48_v30, %v47_v29  ;;  %v247_v62 = vrot.slane %v714_v59, %v246_v58  ;;  %v252_v2 = vrot.slane %v714_v59, %v251_v60  ;;  %v49_v6 = vld [vmem:[#allocation2 + $0x98] sm:$0xff]  ;;  %v51_v9 = vld [vmem:[#allocation2 + $0xa8] sm:$0xff]  ;;  %v52_v10 = vld [vmem:[#allocation2 + $0xb0] sm:$0xff] }
  0x1c   :  { %v593_v8 = vpack.c.bf16 %v50_v7, %v49_v6  ;;  %v596_v11 = vpack.c.bf16 %v52_v10, %v51_v9  ;;  %v53_v12 = vld [vmem:[#allocation2 + $0xb8] sm:$0xff]  ;;  %v55_v15 = vld [vmem:[#allocation2 + $0xc8] sm:$0xff] }
  0x1d   :  { %573 = vmatpush3.bf16.msra.mxu1 %v572_v13  ;;  %v54_v13 = vld [vmem:[#allocation2 + $0xc0] sm:$0xff]  ;;  %v57_v18 = vld [vmem:[#allocation2 + $0xd8] sm:$0xff]  ;;  %v59_v21 = vld [vmem:[#allocation2 + $0xe8] sm:$0xff] }
  0x1e   :  { %574 = vmatprep.subr.bf16.mxu1 %v655_v0  ;;  %594 = vmatpush3.bf16.msra.mxu0 %v593_v8  ;;  %v599_v14 = vpack.c.bf16 %v54_v13, %v53_v12  ;;  %v61_v24 = vld [vmem:[#allocation2 + $0xf8] sm:$0xff]  ;;  %v63_v27 = vld [vmem:[#allocation2 + $0x108] sm:$0xff] }
  0x1f   :  { %595 = vmatprep.subr.bf16.mxu0 %v655_v0 }
  0x21   :  { %576 = vmatpush3.bf16.msra.mxu1 %v575_v16  ;;  %v56_v16 = vld [vmem:[#allocation2 + $0xd0] sm:$0xff] }
  0x22   :  { %577 = vmatprep.subr.bf16.mxu1 %v655_v0  ;;  %597 = vmatpush3.bf16.msra.mxu0 %v596_v11  ;;  %v602_v17 = vpack.c.bf16 %v56_v16, %v55_v15 }
  0x23   :  { %598 = vmatprep.subr.bf16.mxu0 %v655_v0 }
  0x25   :  { %579 = vmatpush3.bf16.msra.mxu1 %v578_v19  ;;  %v58_v19 = vld [vmem:[#allocation2 + $0xe0] sm:$0xff] }
  0x26   :  { %580 = vmatprep.subr.bf16.mxu1 %v655_v0  ;;  %600 = vmatpush3.bf16.msra.mxu0 %v599_v14  ;;  %v605_v20 = vpack.c.bf16 %v58_v19, %v57_v18 }
  0x27   :  { %601 = vmatprep.subr.bf16.mxu0 %v655_v0 }
  0x29   :  { %582 = vmatpush3.bf16.msra.mxu1 %v581_v22  ;;  %v60_v22 = vld [vmem:[#allocation2 + $0xf0] sm:$0xff] }
  0x2a   :  { %583 = vmatprep.subr.bf16.mxu1 %v655_v0  ;;  %603 = vmatpush3.bf16.msra.mxu0 %v602_v17  ;;  %v608_v23 = vpack.c.bf16 %v60_v22, %v59_v21 }
  0x2b   :  { %604 = vmatprep.subr.bf16.mxu0 %v655_v0 }
  0x2d   :  { %585 = vmatpush3.bf16.msra.mxu1 %v584_v25  ;;  %v62_v25 = vld [vmem:[#allocation2 + $0x100] sm:$0xff] }
  0x2e   :  { %586 = vmatprep.subr.bf16.mxu1 %v655_v0  ;;  %606 = vmatpush3.bf16.msra.mxu0 %v605_v20  ;;  %v611_v26 = vpack.c.bf16 %v62_v25, %v61_v24 }
  0x2f   :  { %607 = vmatprep.subr.bf16.mxu0 %v655_v0 }
  0x31   :  { %588 = vmatpush3.bf16.msra.mxu1 %v587_v28  ;;  %v64_v28 = vld [vmem:[#allocation2 + $0x110] sm:$0xff] }
  0x32   :  { %589 = vmatprep.subr.bf16.mxu1 %v655_v0  ;;  %609 = vmatpush3.bf16.msra.mxu0 %v608_v23  ;;  %v614_v29 = vpack.c.bf16 %v64_v28, %v63_v27 }
  0x33   :  { %610 = vmatprep.subr.bf16.mxu0 %v655_v0 }
  0x35   :  { %591 = vmatpush3.bf16.msra.mxu1 %v590_v31 }
  0x36   :  { %612 = vmatpush3.bf16.msra.mxu0 %v611_v26 }
  0x37   :  { %613 = vmatprep.subr.bf16.mxu0 %v655_v0 }
  0x3a   :  { %615 = vmatpush3.bf16.msra.mxu0 %v614_v29 }
  0xe9   :  { %v140_v32 = vpop.f32.mrb[0].mxu1 }
  0xea   :  { %v486_v33 = vpop.f32.mrb[1].mxu1 }
  0xed   :  { %v217_v34 = vpop.f32.mrb[0].mxu0 }
  0xee   :  { %v218_v35 = vadd.f32 %v217_v34, %v140_v32  ;;  %v493_v36 = vpop.f32.mrb[1].mxu0 }
  0xf0   :  { %v221_v37 = vrot.slane %v218_v35, 4  ;;  %v229_v38 = vmul.f32 %v218_v35, %v218_v35 }
  0xf2   :  { %v222_v39 = vadd.f32 %v221_v37, %v218_v35  ;;  %v230_v40 = vrot.slane %v229_v38, 4 }
  0xf4   :  { %v223_v41 = vrot.slane %v222_v39, 2  ;;  %v231_v42 = vadd.f32 %v230_v40, %v229_v38 }
  0xf6   :  { %v224_v43 = vadd.f32 %v223_v41, %v222_v39  ;;  %v232_v44 = vrot.slane %v231_v42, 2 }
  0xf8   :  { %v225_v45 = vrot.slane %v224_v43, 1  ;;  %v233_v46 = vadd.f32 %v232_v44, %v231_v42 }
  0xfa   :  { %v226_v47 = vadd.f32 %v225_v45, %v224_v43  ;;  %v234_v48 = vrot.slane %v233_v46, 1 }
  0xfc   :  { %v228_v49 = vmul.f32 0.125, %v226_v47  ;;  %v235_v50 = vadd.f32 %v234_v48, %v233_v46 }
  0xfe   :  { %v236_v51 = vmul.f32 0.125, %v235_v50  ;;  %v237_v52 = vmul.f32 %v228_v49, %v228_v49  ;;  %v240_v61 = vsub.f32 %v218_v35, %v228_v49  ;;  %v349_v50 = vsub.s32 2, %v711_v57 }
 0x100   :  { %v238_v53 = vsub.f32 %v236_v51, %v237_v52  ;;  %v354_v51 = vsub.s32 3, %v711_v57 }
 0x102   :  { %v239_v54 = vmax.f32 %v238_v53, 0.0  ;;  %v350_v53 = vrot.slane %v714_v59, %v349_v50 }
 0x104   :  { %v241_v56 = vadd.f32 1e-05, %v239_v54 }
 0x106   :  { %624 = vrsqrt.f32 %v241_v56  ;;  %v355_v56 = vrot.slane %v714_v59, %v354_v51 }
 0x110   :  { %v625_v63 = vpop.eup %624 }
 0x111   :  { %v243_v1 = vmul.f32 %v625_v63, %v240_v61 }
 0x113   :  { %v248_v3 = vmul.f32 %v247_v62, %v243_v1  ;;  %v360_v62 = vsub.s32 4, %v711_v57 }
 0x115   :  { %v253_v4 = vadd.f32 %v252_v2, %v248_v3  ;;  %v361_v63 = vrot.slane %v714_v59, %v360_v62 }
 0x117   :  { %v254_v5 = vmax.f32 %v253_v4, 0.0 }
 0x119   :  { %527 = vmatmul.mubr.f32.vlgmr.msra.gmra.mrb[2].mxu1 %v254_v5 }
 0x1ec   :  { %v321_v30 = vpop.f32.mrb[2].mxu1 }
 0x1ed   :  { %v325_v31 = vrot.slane %v321_v30, 4  ;;  %v332_v32 = vmul.f32 %v321_v30, %v321_v30  ;;  %v528_v33 = vpop.f32.mrb[3].mxu1 }
 0x1ef   :  { %v326_v34 = vadd.f32 %v325_v31, %v321_v30  ;;  %v333_v35 = vrot.slane %v332_v32, 4 }
 0x1f1   :  { %v327_v36 = vrot.slane %v326_v34, 2  ;;  %v334_v37 = vadd.f32 %v333_v35, %v332_v32 }
 0x1f3   :  { %v328_v38 = vadd.f32 %v327_v36, %v326_v34  ;;  %v335_v39 = vrot.slane %v334_v37, 2 }
 0x1f5   :  { %v329_v40 = vrot.slane %v328_v38, 1  ;;  %v336_v41 = vadd.f32 %v335_v39, %v334_v37 }
 0x1f7   :  { %v330_v42 = vadd.f32 %v329_v40, %v328_v38  ;;  %v337_v43 = vrot.slane %v336_v41, 1 }
 0x1f9   :  { %v331_v44 = vmul.f32 0.125, %v330_v42  ;;  %v338_v0 = vadd.f32 %v337_v43, %v336_v41 }
 0x1fb   :  { %v339_v45 = vmul.f32 0.125, %v338_v0  ;;  %v340_v46 = vmul.f32 %v331_v44, %v331_v44  ;;  %v343_v52 = vsub.f32 %v321_v30, %v331_v44 }
 0x1fd   :  { %v341_v47 = vsub.f32 %v339_v45, %v340_v46 }
 0x1ff   :  { %v342_v48 = vmax.f32 %v341_v47, 0.0 }
 0x201   :  { %v344_v49 = vadd.f32 1e-05, %v342_v48 }
 0x203   :  { %626 = vrsqrt.f32 %v344_v49 }
 0x20d   :  { %v627_v54 = vpop.eup %626 }
 0x20e   :  { %v346_v55 = vmul.f32 %v627_v54, %v343_v52 }
 0x210   :  { %v351_v58 = vmul.f32 %v350_v53, %v346_v55 }
 0x212   :  { %v356_v60 = vadd.f32 %v355_v56, %v351_v58 }
 0x214   :  { %v357_v61 = vmax.f32 %v356_v60, 0.0 }
 0x216   :  { %562 = vmatmul.mubr.f32.vlgmr.msra.gmra.mrb[2].mxu0 %v357_v61 }
 0x2e9   :  { %v428_v1 = vpop.f32.mrb[2].mxu0 }
 0x2ea   :  { %v429_v2 = vadd.f32 %v428_v1, %v361_v63  ;;  %v563_v3 = vpop.f32.mrb[3].mxu0 }
 0x2ec   :  { %433 = vst.msk [vmem:[%s738_s3] sm:$0xff] %vm432_vm6, %v429_v2 }
 0x2ed   :  { %438 = vsyncpa [#allocation3], 1 }

</bundles_post_ra>
